<compile_context>
chip_gen: v5e
topology: v5e:2x2
jax: 0.10.0
libtpu: 0.0.40
codegen_flags: <defaults>
</compile_context>

<pallas_src>
import jax
import jax.numpy as jnp
from jax.experimental import pallas as pl
from jax.experimental.pallas import tpu as pltpu

_LANE = 1024        # lane-dense width (multiple of 128)
_TILE_ROWS = 512    # 512 rows x 1024 lanes x 4 B = 2 MiB per tile (f32)


def _identity_kernel(x_ref, o_ref):
    # Forward pass of the (abstract) Model: pass-through.
    o_ref[...] = x_ref[...]


def _identity_copy_2d(x2d):
    """Tiled, pipelined, in-place-aliased identity copy of a (rows, lane) array."""
    rows, lane = x2d.shape
    if rows <= _TILE_ROWS:
        # Full-extent block (exempt from the (8,128) divisibility rule).
        tile_rows = rows
    else:
        tile_rows = _TILE_ROWS  # multiple of 8 -> valid sublane tiling
    grid = (pl.cdiv(rows, tile_rows),)

    return pl.pallas_call(
        _identity_kernel,
        out_shape=jax.ShapeDtypeStruct(x2d.shape, x2d.dtype),
        grid=grid,
        in_specs=[pl.BlockSpec((tile_rows, lane), lambda i: (i, 0))],
        out_specs=pl.BlockSpec((tile_rows, lane), lambda i: (i, 0)),
        # Output aliases the input buffer: no extra HBM output allocation.
        input_output_aliases={0: 0},
        compiler_params=pltpu.CompilerParams(
            # "parallel" lets v7x shard the copy across its 2 TensorCores;
            # neutral on single-TC v5e/v6e.
            dimension_semantics=("parallel",),
            vmem_limit_bytes=32 << 20,
        ),
    )(x2d)


@jax.jit
def model_forward(x):
    """Pallas implementation of Model.forward (identity pass-through).

    Args:
      x: jnp array in NCHW layout, shape (N, C, H, W).
    Returns:
      Array with identical shape/dtype/values.
    """
    orig_shape = x.shape
    total = x.size

    # Flatten to a lane-dense (rows, _LANE) slab. Padding is a no-op when the
    # element count already divides the lane width.
    padded = pl.cdiv(total, _LANE) * _LANE
    flat = x.reshape(total)
    if padded != total:
        flat = jnp.pad(flat, (0, padded - total))
    x2d = flat.reshape(padded // _LANE, _LANE)

    out2d = _identity_copy_2d(x2d)

    out_flat = out2d.reshape(padded)
    if padded != total:
        out_flat = out_flat[:total]
    return out_flat.reshape(orig_shape)


if __name__ == "__main__":
    key = jax.random.PRNGKey(0)
    # Small NCHW input consistent with the module's conv-style usage.
    x = jax.random.normal(key, (2, 4, 16, 16), dtype=jnp.float32)

    y = model_forward(x)
    jax.block_until_ready(y)

    assert y.shape == x.shape and y.dtype == x.dtype
    assert bool(jnp.allclose(y, x)), "identity forward mismatch"

    print("KERNEL_OK")
</pallas_src>

<mosaic_0001>
module attributes {stable_mosaic.version = 11 : i64} {
  func.func @_identity_kernel(%arg0: i32, %arg1: memref<2x1024xf32, #tpu.memory_space<vmem>>, %arg2: memref<2x1024xf32, #tpu.memory_space<vmem>>) attributes {dimension_semantics = [#tpu.dimension_semantics<parallel>], iteration_bounds = array<i64: 1>, scalar_prefetch = 0 : i64, scratch_operands = 0 : i64, tpu.core_type = #tpu.core_type<tc>, window_params = [{transform_indices = @transform_0, window_bounds = array<i64: 2, 1024>}, {transform_indices = @transform_1, window_bounds = array<i64: 2, 1024>}]} {
    %c0 = arith.constant 0 : index
    %c0_0 = arith.constant 0 : index
    %0 = vector.load %arg1[%c0, %c0_0] : memref<2x1024xf32, #tpu.memory_space<vmem>>, vector<2x1024xf32>
    %c0_1 = arith.constant 0 : index
    %c0_2 = arith.constant 0 : index
    %1 = vector.load %arg2[%c0_1, %c0_2] : memref<2x1024xf32, #tpu.memory_space<vmem>>, vector<2x1024xf32>
    tpu.vector_store %arg2[%c0_1, %c0_2], %0 {strides = array<i32>} : memref<2x1024xf32, #tpu.memory_space<vmem>>, vector<2x1024xf32>,
    return
  }
  func.func @transform_0(%arg0: i32) -> (i32, i32) {
    %c0_i32 = arith.constant 0 : i32
    %c0_i32_0 = arith.constant 0 : i32
    return %arg0, %c0_i32 : i32, i32
  }
  func.func @transform_1(%arg0: i32) -> (i32, i32) {
    %c0_i32 = arith.constant 0 : i32
    %c0_i32_0 = arith.constant 0 : i32
    return %arg0, %c0_i32 : i32, i32
  }
}

</mosaic_0001>

<bundles_post_ra>
// kernel: model_forward.1
= control target key start
LH: loop header
LB: loop body
LE: loop exit
PB: predicated region body
PF: predicated region fallthrough
CT: control target
= control target key end

     0   :  { %s38_s0 = inlined_call_operand.vmem [shape: f32[2,1024], index: 0, kind: input, shape index: {}, may-alias: {0,1}]   ;;  %s39_s1 = inlined_call_operand.vmem [shape: f32[2,1024], index: 1, kind: output, shape index: {}, may-alias: {0,1}]  }
   0x1   :  { %v8_v0 = vld [vmem:[%s38_s0] sm:$0xff]  ;;  %v9_v1 = vld [vmem:[%s38_s0 + $0x8] sm:$0xff] }
   0x2   :  { %10 = vst [vmem:[%s39_s1] sm:$0xff] %v8_v0 }
   0x3   :  { %11 = vst [vmem:[%s39_s1 + $0x8] sm:$0xff] %v9_v1 }

</bundles_post_ra>
